<compile_context>
chip_gen: v7x
topology: tpu7x:2x2x1
jax: 0.10.0
libtpu: 0.0.40
codegen_flags: <defaults>
</compile_context>

<pallas_src>
import jax
import jax.numpy as jnp
from jax.experimental import pallas as pl
from jax.experimental.pallas import tpu as pltpu


def _round_up(x, m):
    return ((x + m - 1) // m) * m


def mlp_head_kernel(x_ref, w1_ref, b1_ref, w2_ref, b2_ref, o_ref):
    x = x_ref[...]                                                   # (TB, in_pad) bf16
    # First linear (MXU, f32 accumulate) + bias + ReLU in f32.
    h = jnp.dot(x, w1_ref[...], preferred_element_type=jnp.float32)  # (TB, h_pad) f32
    h = jnp.maximum(h + b1_ref[...], 0.0)
    # Second linear: bf16 MXU operands, f32 accumulate.
    y = jnp.dot(h.astype(jnp.bfloat16), w2_ref[...],
                preferred_element_type=jnp.float32)                  # (TB, feat_pad) f32
    y = y + b2_ref[...]
    # Row-wise L2 normalization (F.normalize(dim=1, p=2, eps=1e-12)).
    # max(sqrt(s), eps) == sqrt(max(s, eps^2)); rsqrt lowers to the EUP slot.
    sq = jnp.sum(y * y, axis=1, keepdims=True)                       # (TB, 1)
    inv = jax.lax.rsqrt(jnp.maximum(sq, 1e-24))
    o_ref[...] = (y * inv).astype(o_ref.dtype)


def mlp_head(x, w1, b1, w2, b2, *, block_b=256):
    """MLPHead forward. Weights are stored transposed: w1 (dim_in, dim_h),
    w2 (dim_h, dim_feat); biases are (1, dim_h) / (1, dim_feat)."""
    B, dim_in = x.shape
    dim_h = w1.shape[1]
    dim_feat = w2.shape[1]

    # Batch tile: big (block_b) when B allows, otherwise the full batch rounded
    # to a multiple of 16 (bf16 sublane packing).
    tb = block_b if B >= block_b else _round_up(B, 16)
    b_pad = _round_up(B, tb)
    num_tiles = b_pad // tb

    # Lane-dense everything: pad all three feature dims to multiples of 128.
    in_pad = _round_up(dim_in, 128)
    h_pad = _round_up(dim_h, 128)
    feat_pad = _round_up(dim_feat, 128)

    # Zero-padding is exact (see header comment).  Pads fuse with the dtype cast.
    x_p = jnp.pad(x, ((0, b_pad - B), (0, in_pad - dim_in))).astype(jnp.bfloat16)
    w1_p = jnp.pad(w1, ((0, in_pad - dim_in), (0, h_pad - dim_h))).astype(jnp.bfloat16)
    b1_p = jnp.pad(b1, ((0, 0), (0, h_pad - dim_h))).astype(jnp.float32)
    w2_p = jnp.pad(w2, ((0, h_pad - dim_h), (0, feat_pad - dim_feat))).astype(jnp.bfloat16)
    b2_p = jnp.pad(b2, ((0, 0), (0, feat_pad - dim_feat))).astype(jnp.float32)

    # Explicit VMEM budget: single-buffered resident weights/biases +
    # double-buffered x/out tiles + headroom for the (tb, h_pad)/(tb, feat_pad)
    # f32 intermediates.
    resident = (w1_p.size + w2_p.size) * 2 + (b1_p.size + b2_p.size) * 4
    tiles = 2 * (tb * in_pad * 2) + 2 * (tb * feat_pad * 4)
    interm = tb * h_pad * (4 + 2) + 2 * tb * feat_pad * 4
    vmem_limit = int(min(max(2 * (resident + tiles + interm), 16 << 20), 100 << 20))

    cost = pl.CostEstimate(
        flops=2 * B * (dim_in * dim_h + dim_h * dim_feat),
        transcendentals=B,
        bytes_accessed=(x_p.size * 2 + w1_p.size * 2 + w2_p.size * 2
                        + b1_p.size * 4 + b2_p.size * 4 + b_pad * feat_pad * 4),
    )

    def resident_spec(shape):
        # Constant block index -> stays VMEM-resident; single-buffer saves VMEM.
        return pl.BlockSpec(shape, lambda i: (0, 0), pipeline_mode=pl.Buffered(1))

    out_p = pl.pallas_call(
        mlp_head_kernel,
        out_shape=jax.ShapeDtypeStruct((b_pad, feat_pad), jnp.float32),
        grid_spec=pltpu.PrefetchScalarGridSpec(
            num_scalar_prefetch=0,
            grid=(num_tiles,),
            in_specs=[
                pl.BlockSpec((tb, in_pad), lambda i: (i, 0)),
                resident_spec((in_pad, h_pad)),
                resident_spec((1, h_pad)),
                resident_spec((h_pad, feat_pad)),
                resident_spec((1, feat_pad)),
            ],
            out_specs=pl.BlockSpec((tb, feat_pad), lambda i: (i, 0)),
        ),
        compiler_params=pltpu.CompilerParams(
            dimension_semantics=("parallel",),
            vmem_limit_bytes=vmem_limit,
        ),
        cost_estimate=cost,
    )(x_p, w1_p, b1_p, w2_p, b2_p)

    # Slice off batch / lane padding.
    return out_p[:B, :dim_feat]


def mlp_head_ref(x, w1, b1, w2, b2):
    h = jnp.maximum(x @ w1 + b1, 0.0)
    y = h @ w2 + b2
    norm = jnp.maximum(jnp.sqrt(jnp.sum(y * y, axis=1, keepdims=True)), 1e-12)
    return y / norm


if __name__ == "__main__":
    # Small shapes consistent with MLPHead(dim_in, dim_feat): dim_h defaults to dim_in.
    B, dim_in, dim_feat = 8, 32, 16
    dim_h = dim_in

    key = jax.random.PRNGKey(0)
    kx, k1, kb1, k2, kb2 = jax.random.split(key, 5)

    x = jax.random.normal(kx, (B, dim_in), dtype=jnp.float32)
    # Linear weights stored transposed: (in, out).
    w1 = jax.random.normal(k1, (dim_in, dim_h), dtype=jnp.float32) * 0.1
    b1 = jax.random.normal(kb1, (1, dim_h), dtype=jnp.float32) * 0.01
    w2 = jax.random.normal(k2, (dim_h, dim_feat), dtype=jnp.float32) * 0.1
    b2 = jax.random.normal(kb2, (1, dim_feat), dtype=jnp.float32) * 0.01

    out = mlp_head(x, w1, b1, w2, b2)
    out = jax.block_until_ready(out)

    ref = mlp_head_ref(x, w1, b1, w2, b2)
    assert out.shape == (B, dim_feat)
    # bf16 MXU operands with f32 accumulation -> relaxed tolerance vs f32 reference.
    assert jnp.allclose(out, ref, atol=2e-2, rtol=2e-2), "mismatch vs reference"

    print("KERNEL_OK")
</pallas_src>

<mosaic_0001>
module attributes {stable_mosaic.version = 11 : i64} {
  func.func @mlp_head_kernel(%arg0: i32, %arg1: memref<16x128xbf16, #tpu.memory_space<vmem>>, %arg2: memref<128x128xbf16, #tpu.memory_space<vmem>>, %arg3: memref<1x128xf32, #tpu.memory_space<vmem>>, %arg4: memref<128x128xbf16, #tpu.memory_space<vmem>>, %arg5: memref<1x128xf32, #tpu.memory_space<vmem>>, %arg6: memref<16x128xf32, #tpu.memory_space<vmem>>) attributes {dimension_semantics = [#tpu.dimension_semantics<parallel>], iteration_bounds = array<i64: 1>, scalar_prefetch = 0 : i64, scratch_operands = 0 : i64, tpu.core_type = #tpu.core_type<tc>, window_params = [{transform_indices = @transform_0, window_bounds = array<i64: 16, 128>}, {pipeline_mode = #tpu.pipeline_mode<synchronous>, transform_indices = @transform_1, window_bounds = array<i64: 128, 128>}, {pipeline_mode = #tpu.pipeline_mode<synchronous>, transform_indices = @transform_2, window_bounds = array<i64: 1, 128>}, {pipeline_mode = #tpu.pipeline_mode<synchronous>, transform_indices = @transform_3, window_bounds = array<i64: 128, 128>}, {pipeline_mode = #tpu.pipeline_mode<synchronous>, transform_indices = @transform_4, window_bounds = array<i64: 1, 128>}, {transform_indices = @transform_5, window_bounds = array<i64: 16, 128>}]} {
    %c0 = arith.constant 0 : index
    %c0_0 = arith.constant 0 : index
    %0 = vector.load %arg1[%c0, %c0_0] : memref<16x128xbf16, #tpu.memory_space<vmem>>, vector<16x128xbf16>
    %c0_1 = arith.constant 0 : index
    %c0_2 = arith.constant 0 : index
    %1 = vector.load %arg2[%c0_1, %c0_2] : memref<128x128xbf16, #tpu.memory_space<vmem>>, vector<128x128xbf16>
    %cst = arith.constant dense<0.000000e+00> : vector<16x128xf32>
    %2 = tpu.matmul %0, %1, %cst {dimension_numbers = #tpu.dot_dimension_numbers<[1], [0], [0], [1], [0, 0, 1, 1], [], []>} : vector<16x128xbf16>, vector<128x128xbf16>, vector<16x128xf32> -> vector<16x128xf32>
    %c0_3 = arith.constant 0 : index
    %c0_4 = arith.constant 0 : index
    %3 = vector.load %arg3[%c0_3, %c0_4] : memref<1x128xf32, #tpu.memory_space<vmem>>, vector<1x128xf32>
    %4 = vector.broadcast %3 : vector<1x128xf32> to vector<16x128xf32>
    %5 = arith.addf %2, %4 : vector<16x128xf32>
    %cst_5 = arith.constant 0.000000e+00 : f32
    %6 = vector.broadcast %cst_5 : f32 to vector<16x128xf32>
    %7 = arith.maximumf %5, %6 : vector<16x128xf32>
    %8 = arith.truncf %7 : vector<16x128xf32> to vector<16x128xbf16>
    %c0_6 = arith.constant 0 : index
    %c0_7 = arith.constant 0 : index
    %9 = vector.load %arg4[%c0_6, %c0_7] : memref<128x128xbf16, #tpu.memory_space<vmem>>, vector<128x128xbf16>
    %cst_8 = arith.constant dense<0.000000e+00> : vector<16x128xf32>
    %10 = tpu.matmul %8, %9, %cst_8 {dimension_numbers = #tpu.dot_dimension_numbers<[1], [0], [0], [1], [0, 0, 1, 1], [], []>} : vector<16x128xbf16>, vector<128x128xbf16>, vector<16x128xf32> -> vector<16x128xf32>
    %c0_9 = arith.constant 0 : index
    %c0_10 = arith.constant 0 : index
    %11 = vector.load %arg5[%c0_9, %c0_10] : memref<1x128xf32, #tpu.memory_space<vmem>>, vector<1x128xf32>
    %12 = vector.broadcast %11 : vector<1x128xf32> to vector<16x128xf32>
    %13 = arith.addf %10, %12 : vector<16x128xf32>
    %14 = arith.mulf %13, %13 : vector<16x128xf32>
    %cst_11 = arith.constant dense<0.000000e+00> : vector<16xf32>
    %15 = vector.multi_reduction <add>, %14, %cst_11 [1] : vector<16x128xf32> to vector<16xf32>
    %16 = vector.shape_cast %15 : vector<16xf32> to vector<16x1xf32>
    %cst_12 = arith.constant 1.000000e-24 : f32
    %17 = vector.broadcast %cst_12 : f32 to vector<16x1xf32>
    %18 = arith.maximumf %16, %17 : vector<16x1xf32>
    %19 = math.rsqrt %18 : vector<16x1xf32>
    %20 = vector.broadcast %19 : vector<16x1xf32> to vector<16x128xf32>
    %21 = arith.mulf %13, %20 : vector<16x128xf32>
    %c0_13 = arith.constant 0 : index
    %c0_14 = arith.constant 0 : index
    %22 = vector.load %arg6[%c0_13, %c0_14] : memref<16x128xf32, #tpu.memory_space<vmem>>, vector<16x128xf32>
    tpu.vector_store %arg6[%c0_13, %c0_14], %21 {strides = array<i32>} : memref<16x128xf32, #tpu.memory_space<vmem>>, vector<16x128xf32>,
    return
  }
  func.func @transform_0(%arg0: i32) -> (i32, i32) {
    %c0_i32 = arith.constant 0 : i32
    %c0_i32_0 = arith.constant 0 : i32
    return %arg0, %c0_i32 : i32, i32
  }
  func.func @transform_1(%arg0: i32) -> (i32, i32) {
    %c0_i32 = arith.constant 0 : i32
    %c0_i32_0 = arith.constant 0 : i32
    %c0_i32_1 = arith.constant 0 : i32
    return %c0_i32, %c0_i32_0 : i32, i32
  }
  func.func @transform_2(%arg0: i32) -> (i32, i32) {
    %c0_i32 = arith.constant 0 : i32
    %c0_i32_0 = arith.constant 0 : i32
    %c0_i32_1 = arith.constant 0 : i32
    return %c0_i32, %c0_i32_0 : i32, i32
  }
  func.func @transform_3(%arg0: i32) -> (i32, i32) {
    %c0_i32 = arith.constant 0 : i32
    %c0_i32_0 = arith.constant 0 : i32
    %c0_i32_1 = arith.constant 0 : i32
    return %c0_i32, %c0_i32_0 : i32, i32
  }
  func.func @transform_4(%arg0: i32) -> (i32, i32) {
    %c0_i32 = arith.constant 0 : i32
    %c0_i32_0 = arith.constant 0 : i32
    %c0_i32_1 = arith.constant 0 : i32
    return %c0_i32, %c0_i32_0 : i32, i32
  }
  func.func @transform_5(%arg0: i32) -> (i32, i32) {
    %c0_i32 = arith.constant 0 : i32
    %c0_i32_0 = arith.constant 0 : i32
    return %arg0, %c0_i32 : i32, i32
  }
}

</mosaic_0001>

<bundles_post_ra>
// kernel: tpu_custom_call.1
= control target key start
LH: loop header
LB: loop body
LE: loop exit
PB: predicated region body
PF: predicated region fallthrough
CT: control target
= control target key end

     0   :  { %10 = vsyncpa [#allocation3], 0  ;;  %s642_s0 = inlined_call_operand.hbm [shape: bf16[16,128], index: 0, kind: input, shape index: {}]   ;;  %s643_s1 = inlined_call_operand.hbm [shape: bf16[128,128], index: 1, kind: input, shape index: {}]   ;;  %s644_s2 = inlined_call_operand.vmem [shape: f32[1,128], index: 2, kind: input, shape index: {}]   ;;  %s645_s3 = inlined_call_operand.hbm [shape: bf16[128,128], index: 3, kind: input, shape index: {}]   ;;  %s646_s4 = inlined_call_operand.vmem [shape: f32[1,128], index: 4, kind: input, shape index: {}]   ;;  %s647_s5 = inlined_call_operand.hbm [shape: f32[16,128], index: 5, kind: output, shape index: {}]  }
   0x1   :  { %11 = vsyncpa [#allocation6], 0 }
   0x2   :  { %12 = vsyncpa [#allocation4], 0  ;;  %s532_s18 = smov [#allocation5]   ;;  %s533_s20 = smov [#allocation2]  }
   0x3   :  { %s30_s19 = sshll.u32 %s532_s18, 4  ;;  %s18_s21 = sshll.u32 %s533_s20, 4  ;;  %s31_s19 = int_to_ptr.vmem [resolvable:$true] %s30_s19  ;;  %s572_s21 = int_to_ptr.vmem [resolvable:$true] %s18_s21 }
   0x4   :  { %s438_s24 = scalar_lea.hbm %s643_s1, 1024 }
   0x5   :  { %p439_p0 = scmp.ne.s32.totalorder %s643_s1, %s438_s24  ;;  %p442_p1 = scmp.lt.u32.totalorder %s438_s24, %s643_s1 }
   0x7   :  { %p444_p2 = pnand %p442_p1, %p439_p0 }
   0x9   :  { %447 = shalt.err (!%p444_p2)
}
   0xa   :  { %s448_s29 = scalar_lea.vmem %s31_s19, 1024  ;;  %p453_p4 = scmp.lt.s32.totalorder %s31_s19, %s31_s19 }
   0xb   :  { %p449_p3 = scmp.ne.s32.totalorder %s31_s19, %s448_s29  ;;  %p454_p5 = scmp.lt.s32.totalorder %s448_s29, %s448_s29 }
   0xd   :  { %p455_p6 = por %p454_p5, %p453_p4 }
   0xf   :  { %p456_p7 = pnand %p455_p6, %p449_p3 }
  0x11   :  { %459 = shalt.err (!%p456_p7)
}
  0x12   :  { %s534_s30 = smov 64   ;;  %s535_s6 = smov 4  }
  0x13   :  { %36 = dma.hbm_to_vmem [thread:$0]  %s643_s1, 1024, %s31_s19, [#allocation6], %s534_s30, %s534_s30, %s535_s6  }
  0x14   :  { %s460_s11 = scalar_lea.hbm %s642_s0, 128 }
  0x15   :  { %p461_p8 = scmp.ne.s32.totalorder %s642_s0, %s460_s11  ;;  %p464_p9 = scmp.lt.u32.totalorder %s460_s11, %s642_s0 }
  0x17   :  { %p466_p10 = pnand %p464_p9, %p461_p8 }
  0x19   :  { %469 = shalt.err (!%p466_p10)
}
  0x1a   :  { %s470_s16 = scalar_lea.vmem %s572_s21, 128  ;;  %p475_p12 = scmp.lt.s32.totalorder %s572_s21, %s572_s21 }
  0x1b   :  { %p471_p11 = scmp.ne.s32.totalorder %s572_s21, %s470_s16  ;;  %p476_p13 = scmp.lt.s32.totalorder %s470_s16, %s470_s16 }
  0x1d   :  { %p477_p0 = por %p476_p13, %p475_p12 }
  0x1f   :  { %p478_p1 = pnand %p477_p0, %p471_p11 }
  0x21   :  { %481 = shalt.err (!%p478_p1)
}
  0x22   :  { %24 = dma.hbm_to_vmem [thread:$0]  %s642_s0, 128, %s572_s21, [#allocation3], %s534_s30, %s534_s30, %s535_s6  }
  0x23   :  { %s536_s18 = smov [#allocation7]   ;;  %s482_s23 = scalar_lea.hbm %s645_s3, 1024 }
  0x24   :  { %s44_s19 = sshll.u32 %s536_s18, 4  ;;  %p483_p2 = scmp.ne.s32.totalorder %s645_s3, %s482_s23  ;;  %s45_s19 = int_to_ptr.vmem [resolvable:$true] %s44_s19 }
  0x25   :  { %p486_p3 = scmp.lt.u32.totalorder %s482_s23, %s645_s3 }
  0x27   :  { %p488_p4 = pnand %p486_p3, %p483_p2 }
  0x29   :  { %491 = shalt.err (!%p488_p4)
}
  0x2a   :  { %s492_s28 = scalar_lea.vmem %s45_s19, 1024  ;;  %p497_p6 = scmp.lt.s32.totalorder %s45_s19, %s45_s19 }
  0x2b   :  { %p493_p5 = scmp.ne.s32.totalorder %s45_s19, %s492_s28  ;;  %p498_p7 = scmp.lt.s32.totalorder %s492_s28, %s492_s28 }
  0x2d   :  { %p499_p8 = por %p498_p7, %p497_p6 }
  0x2f   :  { %p500_p9 = pnand %p499_p8, %p493_p5 }
  0x31   :  { %503 = shalt.err (!%p500_p9)
}
  0x32   :  { %50 = dma.hbm_to_vmem [thread:$0]  %s645_s3, 1024, %s45_s19, [#allocation6], %s534_s30, %s534_s30, %s535_s6  }
  0x33   :  { %526 = dma.done.wait [#allocation3], 128  }
  0x34   :  { %527 = vsyncadd [#allocation3], 4294967168 }
  0x35   :  { %528 = dma.done.wait [#allocation6], 2048  }
  0x36   :  { %529 = vsyncadd [#allocation6], 4294965248  ;;  %v537_v0 = vmov 0.0   ;;  %vm538_vm0 = vmmov 0   ;;  %v417_v1 = vld [vmem:[#allocation5] sm:$0xff]   ;;  %v418_v2 = vld [vmem:[#allocation5 + $0x8] sm:$0xff]  }
  0x37   :  { %367 = vmatprep.subr.bf16.mxu0 %v537_v0  ;;  %383 = vmatprep.mubr.msk.bf16.mxu0 %vm538_vm0, %v537_v0  ;;  %v419_v3 = vld [vmem:[#allocation5 + $0x10] sm:$0xff]   ;;  %v426_v4 = vld [vmem:[#allocation7] sm:$0xff]   ;;  %v420_v5 = vld [vmem:[#allocation5 + $0x18] sm:$0xff]  }
  0x38   :  { %387 = vmatprep.subr.bf16.mxu1 %v537_v0  ;;  %403 = vmatprep.mubr.msk.bf16.mxu1 %vm538_vm0, %v537_v0  ;;  %v427_v6 = vld [vmem:[#allocation7 + $0x8] sm:$0xff]   ;;  %v421_v7 = vld [vmem:[#allocation5 + $0x20] sm:$0xff]   ;;  %v428_v8 = vld [vmem:[#allocation7 + $0x10] sm:$0xff]  }
  0x39   :  { %368 = vmatpush3.bf16.msra.mxu0 %v417_v1  ;;  %388 = vmatpush3.bf16.msra.mxu1 %v426_v4  ;;  %v422_v9 = vld [vmem:[#allocation5 + $0x28] sm:$0xff]   ;;  %v429_v10 = vld [vmem:[#allocation7 + $0x18] sm:$0xff]   ;;  %v423_v11 = vld [vmem:[#allocation5 + $0x30] sm:$0xff]  }
  0x3a   :  { %369 = vmatprep.subr.bf16.mxu0 %v537_v0  ;;  %389 = vmatprep.subr.bf16.mxu1 %v537_v0  ;;  %v430_v12 = vld [vmem:[#allocation7 + $0x20] sm:$0xff]   ;;  %v424_v13 = vld [vmem:[#allocation5 + $0x38] sm:$0xff]   ;;  %v431_v14 = vld [vmem:[#allocation7 + $0x28] sm:$0xff]  }
  0x3b   :  { %v425_v15 = vld [vmem:[#allocation2] sm:$0xff]   ;;  %v432_v16 = vld [vmem:[#allocation7 + $0x30] sm:$0xff]  }
  0x3c   :  { %v433_v17 = vld [vmem:[#allocation7 + $0x38] sm:$0xff]  }
  0x3d   :  { %370 = vmatpush3.bf16.msra.mxu0 %v418_v2  ;;  %390 = vmatpush3.bf16.msra.mxu1 %v427_v6  ;;  %v330_v18 = vld [vmem:[%s644_s2] ss:$0 sm:$0xff]  ;;  %s539_s2 = smov [#allocation8]  }
  0x3e   :  { %371 = vmatprep.subr.bf16.mxu0 %v537_v0  ;;  %391 = vmatprep.subr.bf16.mxu1 %v537_v0  ;;  %v340_v28 = vld [vmem:[%s646_s4] ss:$0 sm:$0xff]  ;;  %s317_s4 = sshll.u32 %s539_s2, 4  ;;  %s318_s4 = int_to_ptr.vmem [resolvable:$true] %s317_s4 }
  0x3f   :  { %s504_s7 = scalar_lea.vmem %s318_s4, 256  ;;  %p509_p11 = scmp.lt.s32.totalorder %s318_s4, %s318_s4 }
  0x40   :  { %p505_p10 = scmp.ne.s32.totalorder %s318_s4, %s504_s7  ;;  %p510_p12 = scmp.lt.s32.totalorder %s504_s7, %s504_s7 }
  0x41   :  { %372 = vmatpush3.bf16.msra.mxu0 %v419_v3  ;;  %392 = vmatpush3.bf16.msra.mxu1 %v428_v8 }
  0x42   :  { %373 = vmatprep.subr.bf16.mxu0 %v537_v0  ;;  %393 = vmatprep.subr.bf16.mxu1 %v537_v0  ;;  %p511_p13 = por %p510_p12, %p509_p11 }
  0x44   :  { %p512_p0 = pnand %p511_p13, %p505_p10 }
  0x45   :  { %374 = vmatpush3.bf16.msra.mxu0 %v420_v5  ;;  %394 = vmatpush3.bf16.msra.mxu1 %v429_v10 }
  0x46   :  { %375 = vmatprep.subr.bf16.mxu0 %v537_v0  ;;  %395 = vmatprep.subr.bf16.mxu1 %v537_v0 }
  0x49   :  { %376 = vmatpush3.bf16.msra.mxu0 %v421_v7  ;;  %396 = vmatpush3.bf16.msra.mxu1 %v430_v12 }
  0x4a   :  { %377 = vmatprep.subr.bf16.mxu0 %v537_v0  ;;  %397 = vmatprep.subr.bf16.mxu1 %v537_v0 }
  0x4d   :  { %378 = vmatpush3.bf16.msra.mxu0 %v422_v9  ;;  %398 = vmatpush3.bf16.msra.mxu1 %v431_v14 }
  0x4e   :  { %379 = vmatprep.subr.bf16.mxu0 %v537_v0  ;;  %399 = vmatprep.subr.bf16.mxu1 %v537_v0 }
  0x51   :  { %380 = vmatpush3.bf16.msra.mxu0 %v423_v11  ;;  %400 = vmatpush3.bf16.msra.mxu1 %v432_v16 }
  0x52   :  { %381 = vmatprep.subr.bf16.mxu0 %v537_v0  ;;  %401 = vmatprep.subr.bf16.mxu1 %v537_v0 }
  0x55   :  { %382 = vmatpush3.bf16.msra.mxu0 %v424_v13  ;;  %402 = vmatpush3.bf16.msra.mxu1 %v433_v17 }
  0x58   :  { %384 = vmatmul.mubr.bf16.vlgmr.msra.gmra.mrb[0].mxu0 %v425_v15 }
 0x12b   :  { %v176_v19 = vpop.f32.mrb[0].mxu0 }
 0x12c   :  { %v177_v20 = vadd.f32 %v330_v18, %v176_v19  ;;  %v385_v21 = vpop.f32.mrb[1].mxu0 }
 0x12d   :  { %v179_v22 = vpop.f32.mrb[2].mxu0 }
 0x12e   :  { %v180_v23 = vadd.f32 %v330_v18, %v179_v22  ;;  %v386_v24 = vpop.f32.mrb[3].mxu0  ;;  %v183_v25 = vmax.f32 %v177_v20, 0.0 }
 0x130   :  { %v184_v26 = vmax.f32 %v180_v23, 0.0 }
 0x132   :  { %v185_v27 = vpack.c.bf16 %v184_v26, %v183_v25 }
 0x134   :  { %404 = vmatmul.mubr.bf16.vlgmr.msra.gmra.mrb[0].mxu1 %v185_v27 }
 0x207   :  { %v291_v29 = vpop.f32.mrb[0].mxu1 }
 0x208   :  { %v292_v30 = vadd.f32 %v340_v28, %v291_v29  ;;  %v405_v31 = vpop.f32.mrb[1].mxu1 }
 0x209   :  { %v294_v32 = vpop.f32.mrb[2].mxu1 }
 0x20a   :  { %v295_v33 = vadd.f32 %v340_v28, %v294_v32  ;;  %v406_v34 = vpop.f32.mrb[3].mxu1  ;;  %v298_v35 = vmul.f32 %v292_v30, %v292_v30 }
 0x20c   :  { %300 = vadd.xlane.f32.xlu0 %v298_v35  ;;  %v299_v36 = vmul.f32 %v295_v33, %v295_v33 }
 0x210   :  { %302 = vadd.xlane.f32.xlu0 %v299_v36 }
 0x299   :  { %v301_v37 = vpop.xlane.xlu0 %300 }
 0x29a   :  { %v304_v38 = vmax.f32 %v301_v37, 1e-24 }
 0x29c   :  { %434 = vrsqrt.f32 %v304_v38 }
 0x29d   :  { %v303_v39 = vpop.xlane.xlu0 %302 }
 0x29e   :  { %v305_v40 = vmax.f32 %v303_v39, 1e-24 }
 0x2a0   :  { %436 = vrsqrt.f32 %v305_v40 }
 0x2a6   :  { %v435_v41 = vpop.eup %434 }
 0x2a7   :  { %v308_v42 = vmul.f32 %v435_v41, %v292_v30 }
 0x2a9   :  { %310 = vst [vmem:[#allocation8] sm:$0xff] %v308_v42 }
 0x2aa   :  { %v437_v43 = vpop.eup %436 }
 0x2ab   :  { %v309_v44 = vmul.f32 %v437_v43, %v295_v33 }
 0x2ad   :  { %311 = vst [vmem:[#allocation8 + $0x8] sm:$0xff] %v309_v44 }
 0x2ae   :  { %515 = shalt.err (!%p512_p0)
}
 0x2af   :  { %s516_s10 = scalar_lea.hbm %s647_s5, 256 }
 0x2b0   :  { %p517_p1 = scmp.ne.s32.totalorder %s647_s5, %s516_s10  ;;  %p520_p2 = scmp.lt.u32.totalorder %s516_s10, %s647_s5 }
 0x2b2   :  { %p522_p3 = pnand %p520_p2, %p517_p1 }
 0x2b4   :  { %525 = shalt.err (!%p522_p3)
}
 0x2b5   :  { %s540_s15 = smov 128   ;;  %s541_s16 = smov 8  }
 0x2b6   :  { %323 = dma.vmem_to_hbm [thread:$0]  %s318_s4, 256, %s647_s5, [#allocation4], %s540_s15, %s540_s15, %s541_s16  }
 0x2b7   :  { %530 = dma.done.wait [#allocation4], 256  }
 0x2b8   :  { %531 = vsyncadd [#allocation4], 4294967040 }
 0x2b9   :  { %327 = vsyncpa [#allocation3], 1 }
 0x2ba   :  { %328 = vsyncpa [#allocation6], 1 }
 0x2bb   :  { %329 = vsyncpa [#allocation4], 1 }

</bundles_post_ra>
